<compile_context>
chip_gen: v5e
topology: v5e:2x2
jax: 0.10.0
libtpu: 0.0.40
codegen_flags: <defaults>
</compile_context>

<pallas_src>
import jax
import jax.numpy as jnp
from jax.experimental import pallas as pl
from jax.experimental.pallas import tpu as pltpu


def _round_up(n: int, m: int) -> int:
    return ((n + m - 1) // m) * m


def _qnet_kernel(x_ref, w1_ref, b1_ref, w2_ref, b2_ref, w3_ref, b3_ref, out_ref):
    # x_ref:  (TB, S)   f32  -- one batch tile (ragged last tile allowed)
    # w1_ref: (S, 64)   bf16 -- resident across the grid
    # b1_ref: (1, 64)   f32
    # w2_ref: (64, 64)  bf16
    # b2_ref: (1, 64)   f32
    # w3_ref: (64, A)   bf16
    # b3_ref: (1, A)    f32
    # out_ref:(TB, A)   f32
    x = x_ref[...].astype(jnp.bfloat16)  # cast in-kernel (free VPU work under DMA slack)

    # Layer 1: bf16 MXU matmul, f32 accumulate; bias + ReLU in f32.
    h1 = jnp.dot(x, w1_ref[...], preferred_element_type=jnp.float32)
    h1 = jnp.maximum(h1 + b1_ref[...], 0.0)

    # Layer 2.
    h2 = jnp.dot(h1.astype(jnp.bfloat16), w2_ref[...],
                 preferred_element_type=jnp.float32)
    h2 = jnp.maximum(h2 + b2_ref[...], 0.0)

    # Layer 3 (no activation), direct (TB, A) store.
    out = jnp.dot(h2.astype(jnp.bfloat16), w3_ref[...],
                  preferred_element_type=jnp.float32)
    out_ref[...] = (out + b3_ref[...]).astype(out_ref.dtype)


def prepare_qnet_params(params):
    """One-time parameter prep (hoisted out of the per-call wrapper).

    Casts weights to bf16 for the MXU and keeps biases in f32 (1, out) layout.
    Call once at init / after each optimizer update, not per forward.
    """
    return {
        "w1": params["w1"].astype(jnp.bfloat16),
        "b1": params["b1"].astype(jnp.float32).reshape(1, -1),
        "w2": params["w2"].astype(jnp.bfloat16),
        "b2": params["b2"].astype(jnp.float32).reshape(1, -1),
        "w3": params["w3"].astype(jnp.bfloat16),
        "b3": params["b3"].astype(jnp.float32).reshape(1, -1),
    }


def q_net_forward(x, kparams, *, block_batch=2048):
    """Q_net forward pass as one batch-tiled Pallas kernel.

    x:        (B, state_space) float32
    kparams:  output of prepare_qnet_params (bf16 weights, f32 biases)
    returns   (B, action_space) float32
    """
    w1, b1 = kparams["w1"], kparams["b1"]
    w2, b2 = kparams["w2"], kparams["b2"]
    w3, b3 = kparams["w3"], kparams["b3"]

    B, S = x.shape
    H = w1.shape[1]            # 64
    A = w3.shape[1]

    # Batch tile: multiple of 8 sublanes; aim for >= 4 grid steps so the pipeline has
    # work to overlap and v7x can shard steps across its two TensorCores.
    TB = min(block_batch, max(8, _round_up(pl.cdiv(B, 4), 8)))
    TB = _round_up(TB, 8)
    grid = (pl.cdiv(B, TB),)   # ragged last block: OOB output rows are masked

    flops = 2 * B * (S * H + H * H + H * A)
    bytes_accessed = (
        x.size * 4                                   # x (f32, read once)
        + (w1.size + w2.size + w3.size) * 2          # weights (bf16, resident)
        + (b1.size + b2.size + b3.size) * 4          # biases (f32)
        + B * A * 4                                  # output (f32)
    )

    out = pl.pallas_call(
        _qnet_kernel,
        out_shape=jax.ShapeDtypeStruct((B, A), jnp.float32),
        grid=grid,
        in_specs=[
            pl.BlockSpec((TB, S), lambda i: (i, 0)),   # x: tiled over batch
            pl.BlockSpec((S, H), lambda i: (0, 0)),    # w1: resident
            pl.BlockSpec((1, H), lambda i: (0, 0)),    # b1: resident
            pl.BlockSpec((H, H), lambda i: (0, 0)),    # w2: resident
            pl.BlockSpec((1, H), lambda i: (0, 0)),    # b2: resident
            pl.BlockSpec((H, A), lambda i: (0, 0)),    # w3: resident
            pl.BlockSpec((1, A), lambda i: (0, 0)),    # b3: resident
        ],
        out_specs=pl.BlockSpec((TB, A), lambda i: (i, 0)),
        compiler_params=pltpu.CompilerParams(
            dimension_semantics=("parallel",)),        # v7x dual-TC sharding
        cost_estimate=pl.CostEstimate(
            flops=flops, transcendentals=0, bytes_accessed=bytes_accessed),
    )(x, w1, b1, w2, b2, w3, b3)

    return out


def init_params(key, state_space, action_space):
    """Deterministic PyTorch-style init: U(-1/sqrt(fan_in), 1/sqrt(fan_in))."""
    def linear(key, fan_in, fan_out):
        kw, kb = jax.random.split(key)
        bound = 1.0 / jnp.sqrt(jnp.float32(fan_in))
        w = jax.random.uniform(kw, (fan_in, fan_out), jnp.float32, -bound, bound)
        b = jax.random.uniform(kb, (1, fan_out), jnp.float32, -bound, bound)
        return w, b

    k1, k2, k3 = jax.random.split(key, 3)
    w1, b1 = linear(k1, state_space, 64)
    w2, b2 = linear(k2, 64, 64)
    w3, b3 = linear(k3, 64, action_space)
    return {"w1": w1, "b1": b1, "w2": w2, "b2": b2, "w3": w3, "b3": b3}


if __name__ == "__main__":
    # TODO(synk): sample_action's epsilon-greedy uses host-side python RNG; argmax over
    # the returned Q-values is left to the caller (no kernel needed for it).
    key = jax.random.PRNGKey(0)
    k_params, k_x = jax.random.split(key)

    state_space = 4     # e.g. CartPole observation dim
    action_space = 2    # e.g. CartPole action dim
    batch = 8

    params = init_params(k_params, state_space, action_space)
    kparams = prepare_qnet_params(params)       # one-time prep, hoisted out of forward
    x = jax.random.normal(k_x, (batch, state_space), jnp.float32)

    out = q_net_forward(x, kparams)
    out = jax.block_until_ready(out)
    assert out.shape == (batch, action_space)

    def bf(a):
        return a.astype(jnp.bfloat16).astype(jnp.float32)

    def refs(xx):
        # Reference 1: emulate the kernel's bf16-input / f32-accumulate matmuls.
        h1 = jnp.maximum(bf(xx) @ bf(params["w1"]) + params["b1"], 0.0)
        h2 = jnp.maximum(bf(h1) @ bf(params["w2"]) + params["b2"], 0.0)
        ref_bf16 = bf(h2) @ bf(params["w3"]) + params["b3"]
        # Reference 2: pure-f32 PyTorch-equivalent forward.
        h1f = jnp.maximum(xx @ params["w1"] + params["b1"], 0.0)
        h2f = jnp.maximum(h1f @ params["w2"] + params["b2"], 0.0)
        ref_f32 = h2f @ params["w3"] + params["b3"]
        return ref_bf16, ref_f32

    ref_bf16, ref_f32 = refs(x)
    assert jnp.allclose(out, ref_bf16, atol=1e-3, rtol=1e-3), "bf16-matched reference mismatch"
    assert jnp.allclose(out, ref_f32, atol=5e-2, rtol=5e-2), "f32 reference mismatch"

    # Exercise the ragged last block (B not a multiple of TB).
    x2 = jax.random.normal(jax.random.PRNGKey(1), (13, state_space), jnp.float32)
    out2 = jax.block_until_ready(q_net_forward(x2, kparams))
    ref2_bf16, ref2_f32 = refs(x2)
    assert out2.shape == (13, action_space)
    assert jnp.allclose(out2, ref2_bf16, atol=1e-3, rtol=1e-3), "ragged bf16 reference mismatch"
    assert jnp.allclose(out2, ref2_f32, atol=5e-2, rtol=5e-2), "ragged f32 reference mismatch"

    print("KERNEL_OK")
</pallas_src>

<mosaic_0001>
module attributes {stable_mosaic.version = 11 : i64} {
  func.func @_qnet_kernel(%arg0: i32, %arg1: memref<8x4xf32, #tpu.memory_space<vmem>>, %arg2: memref<4x64xbf16, #tpu.memory_space<vmem>>, %arg3: memref<1x64xf32, #tpu.memory_space<vmem>>, %arg4: memref<64x64xbf16, #tpu.memory_space<vmem>>, %arg5: memref<1x64xf32, #tpu.memory_space<vmem>>, %arg6: memref<64x2xbf16, #tpu.memory_space<vmem>>, %arg7: memref<1x2xf32, #tpu.memory_space<vmem>>, %arg8: memref<8x2xf32, #tpu.memory_space<vmem>>) attributes {dimension_semantics = [#tpu.dimension_semantics<parallel>], iteration_bounds = array<i64: 1>, scalar_prefetch = 0 : i64, scratch_operands = 0 : i64, tpu.core_type = #tpu.core_type<tc>, window_params = [{transform_indices = @transform_0, window_bounds = array<i64: 8, 4>}, {pipeline_mode = #tpu.pipeline_mode<synchronous>, transform_indices = @transform_1, window_bounds = array<i64: 4, 64>}, {pipeline_mode = #tpu.pipeline_mode<synchronous>, transform_indices = @transform_2, window_bounds = array<i64: 1, 64>}, {pipeline_mode = #tpu.pipeline_mode<synchronous>, transform_indices = @transform_3, window_bounds = array<i64: 64, 64>}, {pipeline_mode = #tpu.pipeline_mode<synchronous>, transform_indices = @transform_4, window_bounds = array<i64: 1, 64>}, {pipeline_mode = #tpu.pipeline_mode<synchronous>, transform_indices = @transform_5, window_bounds = array<i64: 64, 2>}, {pipeline_mode = #tpu.pipeline_mode<synchronous>, transform_indices = @transform_6, window_bounds = array<i64: 1, 2>}, {transform_indices = @transform_7, window_bounds = array<i64: 8, 2>}]} {
    %c0 = arith.constant 0 : index
    %c0_0 = arith.constant 0 : index
    %0 = vector.load %arg1[%c0, %c0_0] : memref<8x4xf32, #tpu.memory_space<vmem>>, vector<8x4xf32>
    %1 = arith.truncf %0 : vector<8x4xf32> to vector<8x4xbf16>
    %c0_1 = arith.constant 0 : index
    %c0_2 = arith.constant 0 : index
    %2 = vector.load %arg2[%c0_1, %c0_2] : memref<4x64xbf16, #tpu.memory_space<vmem>>, vector<4x64xbf16>
    %cst = arith.constant dense<0.000000e+00> : vector<8x64xf32>
    %3 = tpu.matmul %1, %2, %cst {dimension_numbers = #tpu.dot_dimension_numbers<[1], [0], [0], [1], [0, 0, 1, 1], [], []>} : vector<8x4xbf16>, vector<4x64xbf16>, vector<8x64xf32> -> vector<8x64xf32>
    %c0_3 = arith.constant 0 : index
    %c0_4 = arith.constant 0 : index
    %4 = vector.load %arg3[%c0_3, %c0_4] : memref<1x64xf32, #tpu.memory_space<vmem>>, vector<1x64xf32>
    %5 = vector.broadcast %4 : vector<1x64xf32> to vector<8x64xf32>
    %6 = arith.addf %3, %5 : vector<8x64xf32>
    %cst_5 = arith.constant 0.000000e+00 : f32
    %7 = vector.broadcast %cst_5 : f32 to vector<8x64xf32>
    %8 = arith.maximumf %6, %7 : vector<8x64xf32>
    %9 = arith.truncf %8 : vector<8x64xf32> to vector<8x64xbf16>
    %c0_6 = arith.constant 0 : index
    %c0_7 = arith.constant 0 : index
    %10 = vector.load %arg4[%c0_6, %c0_7] : memref<64x64xbf16, #tpu.memory_space<vmem>>, vector<64x64xbf16>
    %cst_8 = arith.constant dense<0.000000e+00> : vector<8x64xf32>
    %11 = tpu.matmul %9, %10, %cst_8 {dimension_numbers = #tpu.dot_dimension_numbers<[1], [0], [0], [1], [0, 0, 1, 1], [], []>} : vector<8x64xbf16>, vector<64x64xbf16>, vector<8x64xf32> -> vector<8x64xf32>
    %c0_9 = arith.constant 0 : index
    %c0_10 = arith.constant 0 : index
    %12 = vector.load %arg5[%c0_9, %c0_10] : memref<1x64xf32, #tpu.memory_space<vmem>>, vector<1x64xf32>
    %13 = vector.broadcast %12 : vector<1x64xf32> to vector<8x64xf32>
    %14 = arith.addf %11, %13 : vector<8x64xf32>
    %cst_11 = arith.constant 0.000000e+00 : f32
    %15 = vector.broadcast %cst_11 : f32 to vector<8x64xf32>
    %16 = arith.maximumf %14, %15 : vector<8x64xf32>
    %17 = arith.truncf %16 : vector<8x64xf32> to vector<8x64xbf16>
    %c0_12 = arith.constant 0 : index
    %c0_13 = arith.constant 0 : index
    %18 = vector.load %arg6[%c0_12, %c0_13] : memref<64x2xbf16, #tpu.memory_space<vmem>>, vector<64x2xbf16>
    %cst_14 = arith.constant dense<0.000000e+00> : vector<8x2xf32>
    %19 = tpu.matmul %17, %18, %cst_14 {dimension_numbers = #tpu.dot_dimension_numbers<[1], [0], [0], [1], [0, 0, 1, 1], [], []>} : vector<8x64xbf16>, vector<64x2xbf16>, vector<8x2xf32> -> vector<8x2xf32>
    %c0_15 = arith.constant 0 : index
    %c0_16 = arith.constant 0 : index
    %20 = vector.load %arg7[%c0_15, %c0_16] : memref<1x2xf32, #tpu.memory_space<vmem>>, vector<1x2xf32>
    %21 = vector.broadcast %20 : vector<1x2xf32> to vector<8x2xf32>
    %22 = arith.addf %19, %21 : vector<8x2xf32>
    %c0_17 = arith.constant 0 : index
    %c0_18 = arith.constant 0 : index
    %23 = vector.load %arg8[%c0_17, %c0_18] : memref<8x2xf32, #tpu.memory_space<vmem>>, vector<8x2xf32>
    tpu.vector_store %arg8[%c0_17, %c0_18], %22 {strides = array<i32>} : memref<8x2xf32, #tpu.memory_space<vmem>>, vector<8x2xf32>,
    return
  }
  func.func @transform_0(%arg0: i32) -> (i32, i32) {
    %c0_i32 = arith.constant 0 : i32
    %c0_i32_0 = arith.constant 0 : i32
    return %arg0, %c0_i32 : i32, i32
  }
  func.func @transform_1(%arg0: i32) -> (i32, i32) {
    %c0_i32 = arith.constant 0 : i32
    %c0_i32_0 = arith.constant 0 : i32
    %c0_i32_1 = arith.constant 0 : i32
    return %c0_i32, %c0_i32_0 : i32, i32
  }
  func.func @transform_2(%arg0: i32) -> (i32, i32) {
    %c0_i32 = arith.constant 0 : i32
    %c0_i32_0 = arith.constant 0 : i32
    %c0_i32_1 = arith.constant 0 : i32
    return %c0_i32, %c0_i32_0 : i32, i32
  }
  func.func @transform_3(%arg0: i32) -> (i32, i32) {
    %c0_i32 = arith.constant 0 : i32
    %c0_i32_0 = arith.constant 0 : i32
    %c0_i32_1 = arith.constant 0 : i32
    return %c0_i32, %c0_i32_0 : i32, i32
  }
  func.func @transform_4(%arg0: i32) -> (i32, i32) {
    %c0_i32 = arith.constant 0 : i32
    %c0_i32_0 = arith.constant 0 : i32
    %c0_i32_1 = arith.constant 0 : i32
    return %c0_i32, %c0_i32_0 : i32, i32
  }
  func.func @transform_5(%arg0: i32) -> (i32, i32) {
    %c0_i32 = arith.constant 0 : i32
    %c0_i32_0 = arith.constant 0 : i32
    %c0_i32_1 = arith.constant 0 : i32
    return %c0_i32, %c0_i32_0 : i32, i32
  }
  func.func @transform_6(%arg0: i32) -> (i32, i32) {
    %c0_i32 = arith.constant 0 : i32
    %c0_i32_0 = arith.constant 0 : i32
    %c0_i32_1 = arith.constant 0 : i32
    return %c0_i32, %c0_i32_0 : i32, i32
  }
  func.func @transform_7(%arg0: i32) -> (i32, i32) {
    %c0_i32 = arith.constant 0 : i32
    %c0_i32_0 = arith.constant 0 : i32
    return %arg0, %c0_i32 : i32, i32
  }
}

</mosaic_0001>

<bundles_post_ra>
// kernel: tpu_custom_call.1
= control target key start
LH: loop header
LB: loop body
LE: loop exit
PB: predicated region body
PF: predicated region fallthrough
CT: control target
= control target key end

     0   :  { %vm38_vm0 = vcmask 1041408   ;;  %vm34_vm1 = vcmask 31744   ;;  %vm93_vm2 = vcmask 523264   ;;  %vm164_vm3 = vcmask 15360   ;;  %s298_s1 = inlined_call_operand.vmem [shape: bf16[4,64], index: 1, kind: input, shape index: {}]   ;;  %s299_s0 = inlined_call_operand.vmem [shape: f32[8,4], index: 0, kind: input, shape index: {}]   ;;  %s300_s3 = inlined_call_operand.vmem [shape: bf16[64,64], index: 3, kind: input, shape index: {}]   ;;  %s301_s2 = inlined_call_operand.vmem [shape: f32[1,64], index: 2, kind: input, shape index: {}]   ;;  %s302_s4 = inlined_call_operand.vmem [shape: f32[1,64], index: 4, kind: input, shape index: {}]   ;;  %s303_s5 = inlined_call_operand.vmem [shape: bf16[64,2], index: 5, kind: input, shape index: {}]   ;;  %s304_s6 = inlined_call_operand.vmem [shape: f32[1,2], index: 6, kind: input, shape index: {}]   ;;  %s305_s7 = inlined_call_operand.vmem [shape: f32[8,2], index: 7, kind: output, shape index: {}]  }
   0x1   :  { %v29_v0 = vld [vmem:[%s298_s1] sm:$0x3]  ;;  %v208_v2 = vld [vmem:[%s300_s3 + $0x18] sm:$0xff]  ;;  %v207_v5 = vld [vmem:[%s300_s3 + $0x10] sm:$0xff] }
   0x2   :  { %v27_v1 = vld [vmem:[%s299_s0] sm:$0xff]  ;;  %v40_v3 = vsel %vm38_vm0, %v29_v0, 0  ;;  %101 = vmatpush.bf16.msra.mxu1 %v208_v2  ;;  %v206_v6 = vld [vmem:[%s300_s3 + $0x8] sm:$0xff]  ;;  %v212_v8 = vld [vmem:[%s303_s5 + $0x18] sm:$0xff] }
   0x3   :  { %v28_v4 = vpack.c.bf16 %v27_v1, %v27_v1  ;;  %49 = vmatpush.bf16.msra.mxu0 %v40_v3  ;;  %v205_v7 = vld [vmem:[%s300_s3] sm:$0xff]  ;;  %155 = vmatpush.bf16.msra.mxu2 %v212_v8  ;;  %v211_v9 = vld [vmem:[%s303_s5 + $0x10] sm:$0xff]  ;;  %v210_v16 = vld [vmem:[%s303_s5 + $0x8] sm:$0xff] }
   0x4   :  { %v213_v10 = vld [vmem:[%s301_s2] ss:$0 sm:$0xff] }
   0x5   :  { %v209_v17 = vld [vmem:[%s303_s5] sm:$0xff] }
   0x6   :  { %170 = vmatmul.msk.bf16.vlgmr.msra.gmra.mxu0 %vm34_vm1, %v28_v4  ;;  %102 = vmatpush.bf16.msra.mxu1 %v207_v5  ;;  %v214_v18 = vld [vmem:[%s302_s4] ss:$0 sm:$0xff] }
   0x7   :  { %156 = vmatpush.bf16.msra.mxu2 %v211_v9  ;;  %v215_v24 = vld [vmem:[%s304_s6] ss:$0 sm:$0xff] }
   0xa   :  { %103 = vmatpush.bf16.msra.mxu1 %v206_v6 }
   0xb   :  { %157 = vmatpush.bf16.msra.mxu2 %v210_v16 }
   0xe   :  { %104 = vmatpush.bf16.msra.mxu1 %v205_v7 }
   0xf   :  { %158 = vmatpush.bf16.msra.mxu2 %v209_v17 }
  0x83   :  { %v51_v11 = vpop.f32.mrf.mxu0 }
  0x84   :  { %v52_v12 = vadd.f32 %v213_v10, %v51_v11 }
  0x86   :  { %v55_v13 = vmax.f32 %v52_v12, 0.0 }
  0x88   :  { %v56_v14 = vpack.c.bf16 %v55_v13, %v55_v13 }
  0x8a   :  { %187 = vmatmul.msk.bf16.vlgmr.msra.gmra.mxu1 %vm93_vm2, %v56_v14 }
  0x8b   :  { %v53_v15 = vpop.f32.mrf.mxu0 }
 0x107   :  { %v106_v19 = vpop.f32.mrf.mxu1 }
 0x108   :  { %v107_v20 = vadd.f32 %v214_v18, %v106_v19 }
 0x10a   :  { %v110_v21 = vmax.f32 %v107_v20, 0.0 }
 0x10c   :  { %v111_v22 = vpack.c.bf16 %v110_v21, %v110_v21 }
 0x10e   :  { %204 = vmatmul.msk.bf16.vlgmr.msra.gmra.mxu2 %vm93_vm2, %v111_v22 }
 0x10f   :  { %v108_v23 = vpop.f32.mrf.mxu1 }
 0x191   :  { %v160_v25 = vpop.f32.mrf.mxu2 }
 0x192   :  { %v161_v26 = vadd.f32 %v215_v24, %v160_v25 }
 0x194   :  { %165 = vst.msk [vmem:[%s305_s7] sm:$0xff] %vm164_vm3, %v161_v26 }
 0x199   :  { %v162_v27 = vpop.f32.mrf.mxu2 }

</bundles_post_ra>
